<compile_context>
chip_gen: v7x
topology: tpu7x:2x2x1
jax: 0.10.0
libtpu: 0.0.40
codegen_flags: <defaults>
</compile_context>

<pallas_src>
import jax
import jax.numpy as jnp
from jax.experimental import pallas as pl
from jax.experimental.pallas import tpu as pltpu


# ---------------------------------------------------------------------------
# Pallas kernel: fused TemporalAttention + fc head
# ---------------------------------------------------------------------------
def attn_fc_kernel(x_ref, w_attn_ref, w_fc_ref, b_fc_ref, logits_ref, attn_ref):
    # x_ref:      (Bt, S, H)  LSTM outputs tile (native dtype)
    # w_attn_ref: (1, H)      lane-dense attention scoring vector (f32)
    # w_fc_ref:   (H, C)      fc weight in model dtype (transposed from torch [C, H])
    # b_fc_ref:   (1, C)      fc bias (f32)
    # logits_ref: (Bt, C)
    # attn_ref:   (Bt, S)
    x32 = x_ref[...].astype(jnp.float32)                 # (Bt, S, H) f32
    w = w_attn_ref[...]                                   # (1, H) f32

    # energies: VPU multiply + XLU lane reduce over H (no N=1 MXU matmul)
    e = jnp.sum(x32 * w, axis=-1)                         # (Bt, S) f32

    # softmax over time; single reciprocal on (Bt,1), normalization deferred
    m = jnp.max(e, axis=-1, keepdims=True)                # (Bt, 1)
    p = jnp.exp(e - m)                                    # (Bt, S) unnormalized
    denom = jnp.sum(p, axis=-1, keepdims=True)            # (Bt, 1)
    inv = pl.reciprocal(denom, approx=False)              # exact: keeps 1e-5 tolerance

    # context from unnormalized weights, scaled once at (Bt, H)
    ctx = jnp.sum(x32 * p[..., None], axis=1) * inv       # (Bt, H) f32

    # fused fc head: context never leaves VMEM; matmul in model dtype, f32 accumulate
    logits = jnp.dot(ctx.astype(w_fc_ref.dtype), w_fc_ref[...],
                     preferred_element_type=jnp.float32)
    logits = logits + b_fc_ref[...]                        # (Bt, C) f32

    logits_ref[...] = logits.astype(logits_ref.dtype)
    attn_ref[...] = (p * inv).astype(attn_ref.dtype)


def _vmem_capacity_bytes():
    try:
        return int(pltpu.get_tpu_info().vmem_capacity_bytes)
    except Exception:
        return 64 * 1024 * 1024  # conservative fallback (v7x-sized VMEM)


def _pick_batch_tile(B, S, H, C, in_itemsize, out_itemsize, vmem_cap):
    """Largest legal batch tile whose working set fits a generation-aware budget."""
    budget = vmem_cap // 3
    per_row = (2 * S * H * in_itemsize          # double-buffered input tile
               + 3 * S * H * 4                  # worst-case live f32 intermediates
               + 2 * (S + C) * out_itemsize)    # double-buffered outputs
    bt = max(1, budget // max(per_row, 1))

    # Keep enough grid steps to pipeline DMAs and (on v7x) shard across 2 TCs.
    min_steps = 8 if vmem_cap <= 64 * 1024 * 1024 else 4
    bt = min(bt, max(1, -(-B // min_steps)))
    bt = min(bt, B)

    # Output blocks are (Bt, C)/(Bt, S): keep Bt a multiple of 8 or the full batch.
    if bt >= 8:
        bt = (bt // 8) * 8
    elif B > 8:
        bt = 8
    else:
        bt = B
    return int(bt)


def temporal_attention_fc(lstm_outputs, attn_weight, fc_weight, fc_bias,
                          *, batch_tile=None, interpret=False):
    """
    Fused TemporalAttention + fc.

    Args:
        lstm_outputs: [B, S, H]
        attn_weight:  [1, H]   (torch nn.Linear(H, 1, bias=False).weight layout)
        fc_weight:    [C, H]   (torch nn.Linear(H, C).weight layout)
        fc_bias:      [C]
    Returns:
        logits:       [B, C]
        attn_weights: [B, S]
    """
    B, S, H = lstm_outputs.shape
    C = fc_weight.shape[0]
    dtype = lstm_outputs.dtype
    in_itemsize = jnp.dtype(dtype).itemsize

    vmem_cap = _vmem_capacity_bytes()
    Bt = batch_tile if batch_tile is not None else _pick_batch_tile(
        B, S, H, C, in_itemsize, in_itemsize, vmem_cap)
    grid = (pl.cdiv(B, Bt),)
    vmem_limit = min(vmem_cap * 3 // 4, 100 * 1024 * 1024)

    # TODO(synk): H/S are streamed as-is (no pad to 128/8); zero-padding the full
    # lstm_outputs slab in HBM would cost an extra full-array copy for a layout win.
    w_row = attn_weight.reshape(1, H).astype(jnp.float32)   # lane-dense (1, H)
    w_fc = fc_weight.T.astype(dtype)                         # (H, C), model dtype MXU
    b_fc = fc_bias.reshape(1, C).astype(jnp.float32)

    logits, attn = pl.pallas_call(
        attn_fc_kernel,
        out_shape=(
            jax.ShapeDtypeStruct((B, C), dtype),
            jax.ShapeDtypeStruct((B, S), dtype),
        ),
        grid=grid,
        in_specs=[
            pl.BlockSpec((Bt, S, H), lambda b: (b, 0, 0)),
            pl.BlockSpec((1, H), lambda b: (0, 0)),
            pl.BlockSpec((H, C), lambda b: (0, 0)),
            pl.BlockSpec((1, C), lambda b: (0, 0)),
        ],
        out_specs=(
            pl.BlockSpec((Bt, C), lambda b: (b, 0)),
            pl.BlockSpec((Bt, S), lambda b: (b, 0)),
        ),
        compiler_params=pltpu.CompilerParams(
            dimension_semantics=("parallel",),
            vmem_limit_bytes=int(vmem_limit),
        ),
        interpret=interpret,
    )(lstm_outputs, w_row, w_fc, b_fc)
    return logits, attn


# ---------------------------------------------------------------------------
# LSTM (PyTorch nn.LSTM semantics, batch_first=True, zero initial state)
# ---------------------------------------------------------------------------
def lstm_forward(x, lstm_params):
    # TODO(synk): the LSTM recurrence is inherently sequential over time; it is left
    # to jax.lax.scan / XLA here rather than being forced into a Pallas kernel.
    def one_layer(inp, p):
        w_ih, w_hh, b_ih, b_hh = p                 # [4H,in], [4H,H], [4H], [4H]
        Hh = w_hh.shape[1]
        Bsz = inp.shape[0]
        h0 = jnp.zeros((Bsz, Hh), inp.dtype)
        c0 = jnp.zeros((Bsz, Hh), inp.dtype)

        def step(carry, x_t):
            h, c = carry
            gates = x_t @ w_ih.T + b_ih + h @ w_hh.T + b_hh
            i, f, g, o = jnp.split(gates, 4, axis=-1)
            i = jax.nn.sigmoid(i)
            f = jax.nn.sigmoid(f)
            g = jnp.tanh(g)
            o = jax.nn.sigmoid(o)
            c = f * c + i * g
            h = o * jnp.tanh(c)
            return (h, c), h

        xs = jnp.swapaxes(inp, 0, 1)               # [S, B, in]
        _, hs = jax.lax.scan(step, (h0, c0), xs)
        return jnp.swapaxes(hs, 0, 1)              # [B, S, H]

    out = x
    for p in lstm_params:
        out = one_layer(out, p)
    return out


def lstm_attn_net_forward(x, params, *, interpret=False):
    """Full LSTM_AttnNet forward (dropout is identity at inference)."""
    lstm_out = lstm_forward(x, params["lstm"])
    logits, attn = temporal_attention_fc(
        lstm_out, params["attn_w"], params["fc_w"], params["fc_b"],
        interpret=interpret)
    return logits, attn


# ---------------------------------------------------------------------------
# Pure-JAX reference for the attention + fc head
# ---------------------------------------------------------------------------
def temporal_attention_fc_ref(lstm_outputs, attn_weight, fc_weight, fc_bias):
    energies = jnp.einsum("bsh,h->bs", lstm_outputs, attn_weight[0])
    attn = jax.nn.softmax(energies, axis=1)
    context = jnp.sum(lstm_outputs * attn[..., None], axis=1)
    logits = context @ fc_weight.T + fc_bias
    return logits, attn


if __name__ == "__main__":
    B, S = 2, 8
    input_size, hidden_size, num_layers, num_classes = 32, 32, 1, 4

    key = jax.random.PRNGKey(0)
    k_x, k_lstm, k_attn, k_fcw, k_fcb = jax.random.split(key, 5)

    bound = 1.0 / jnp.sqrt(jnp.float32(hidden_size))

    def u(k, shape):
        return jax.random.uniform(k, shape, jnp.float32, minval=-bound, maxval=bound)

    lstm_params = []
    in_dim = input_size
    k = k_lstm
    for _ in range(num_layers):
        k, k1, k2, k3, k4 = jax.random.split(k, 5)
        lstm_params.append((
            u(k1, (4 * hidden_size, in_dim)),
            u(k2, (4 * hidden_size, hidden_size)),
            u(k3, (4 * hidden_size,)),
            u(k4, (4 * hidden_size,)),
        ))
        in_dim = hidden_size

    params = {
        "lstm": lstm_params,
        "attn_w": u(k_attn, (1, hidden_size)),
        "fc_w": u(k_fcw, (num_classes, hidden_size)),
        "fc_b": u(k_fcb, (num_classes,)),
    }

    x = jax.random.normal(k_x, (B, S, input_size), dtype=jnp.float32)

    logits, attn = lstm_attn_net_forward(x, params)
    logits, attn = jax.block_until_ready((logits, attn))

    # Reference path: identical LSTM, pure-JAX attention + fc head.
    lstm_out = lstm_forward(x, params["lstm"])
    logits_ref, attn_ref = temporal_attention_fc_ref(
        lstm_out, params["attn_w"], params["fc_w"], params["fc_b"])

    assert logits.shape == (B, num_classes) and attn.shape == (B, S)
    assert jnp.allclose(logits, logits_ref, atol=1e-5, rtol=1e-5)
    assert jnp.allclose(attn, attn_ref, atol=1e-5, rtol=1e-5)

    print("KERNEL_OK")
</pallas_src>

<mosaic_0001>
module attributes {stable_mosaic.version = 11 : i64} {
  func.func @attn_fc_kernel(%arg0: i32, %arg1: memref<2x8x32xf32, #tpu.memory_space<vmem>>, %arg2: memref<1x32xf32, #tpu.memory_space<vmem>>, %arg3: memref<32x4xf32, #tpu.memory_space<vmem>>, %arg4: memref<1x4xf32, #tpu.memory_space<vmem>>, %arg5: memref<2x4xf32, #tpu.memory_space<vmem>>, %arg6: memref<2x8xf32, #tpu.memory_space<vmem>>) attributes {dimension_semantics = [#tpu.dimension_semantics<parallel>], iteration_bounds = array<i64: 1>, scalar_prefetch = 0 : i64, scratch_operands = 0 : i64, tpu.core_type = #tpu.core_type<tc>, window_params = [{transform_indices = @transform_0, window_bounds = array<i64: 2, 8, 32>}, {pipeline_mode = #tpu.pipeline_mode<synchronous>, transform_indices = @transform_1, window_bounds = array<i64: 1, 32>}, {pipeline_mode = #tpu.pipeline_mode<synchronous>, transform_indices = @transform_2, window_bounds = array<i64: 32, 4>}, {pipeline_mode = #tpu.pipeline_mode<synchronous>, transform_indices = @transform_3, window_bounds = array<i64: 1, 4>}, {transform_indices = @transform_4, window_bounds = array<i64: 2, 4>}, {transform_indices = @transform_5, window_bounds = array<i64: 2, 8>}]} {
    %c0 = arith.constant 0 : index
    %c0_0 = arith.constant 0 : index
    %c0_1 = arith.constant 0 : index
    %0 = vector.load %arg1[%c0, %c0_0, %c0_1] : memref<2x8x32xf32, #tpu.memory_space<vmem>>, vector<2x8x32xf32>
    %c0_2 = arith.constant 0 : index
    %c0_3 = arith.constant 0 : index
    %1 = vector.load %arg2[%c0_2, %c0_3] : memref<1x32xf32, #tpu.memory_space<vmem>>, vector<1x32xf32>
    %2 = vector.shape_cast %1 : vector<1x32xf32> to vector<1x1x32xf32>
    %3 = vector.broadcast %2 : vector<1x1x32xf32> to vector<2x8x32xf32>
    %4 = arith.mulf %0, %3 : vector<2x8x32xf32>
    %cst = arith.constant dense<0.000000e+00> : vector<2x8xf32>
    %5 = vector.multi_reduction <add>, %4, %cst [2] : vector<2x8x32xf32> to vector<2x8xf32>
    %cst_4 = arith.constant dense<0xFF800000> : vector<2xf32>
    %6 = vector.multi_reduction <maximumf>, %5, %cst_4 [1] : vector<2x8xf32> to vector<2xf32>
    %7 = vector.shape_cast %6 : vector<2xf32> to vector<2x1xf32>
    %8 = vector.broadcast %7 : vector<2x1xf32> to vector<2x8xf32>
    %9 = arith.subf %5, %8 : vector<2x8xf32>
    %10 = math.exp %9 : vector<2x8xf32>
    %cst_5 = arith.constant dense<0.000000e+00> : vector<2xf32>
    %11 = vector.multi_reduction <add>, %10, %cst_5 [1] : vector<2x8xf32> to vector<2xf32>
    %12 = vector.shape_cast %11 : vector<2xf32> to vector<2x1xf32>
    %13 = tpu.reciprocal %12 : vector<2x1xf32> -> vector<2x1xf32>
    %14 = vector.shape_cast %10 : vector<2x8xf32> to vector<2x8x1xf32>
    %15 = vector.broadcast %14 : vector<2x8x1xf32> to vector<2x8x32xf32>
    %16 = arith.mulf %0, %15 : vector<2x8x32xf32>
    %cst_6 = arith.constant dense<0.000000e+00> : vector<2x32xf32>
    %17 = vector.multi_reduction <add>, %16, %cst_6 [1] : vector<2x8x32xf32> to vector<2x32xf32>
    %18 = vector.broadcast %13 : vector<2x1xf32> to vector<2x32xf32>
    %19 = arith.mulf %17, %18 : vector<2x32xf32>
    %c0_7 = arith.constant 0 : index
    %c0_8 = arith.constant 0 : index
    %20 = vector.load %arg3[%c0_7, %c0_8] : memref<32x4xf32, #tpu.memory_space<vmem>>, vector<32x4xf32>
    %cst_9 = arith.constant dense<0.000000e+00> : vector<2x4xf32>
    %21 = tpu.matmul %19, %20, %cst_9 {dimension_numbers = #tpu.dot_dimension_numbers<[1], [0], [0], [1], [0, 0, 1, 1], [], []>} : vector<2x32xf32>, vector<32x4xf32>, vector<2x4xf32> -> vector<2x4xf32>
    %c0_10 = arith.constant 0 : index
    %c0_11 = arith.constant 0 : index
    %22 = vector.load %arg4[%c0_10, %c0_11] : memref<1x4xf32, #tpu.memory_space<vmem>>, vector<1x4xf32>
    %23 = vector.broadcast %22 : vector<1x4xf32> to vector<2x4xf32>
    %24 = arith.addf %21, %23 : vector<2x4xf32>
    %c0_12 = arith.constant 0 : index
    %c0_13 = arith.constant 0 : index
    %25 = vector.load %arg5[%c0_12, %c0_13] : memref<2x4xf32, #tpu.memory_space<vmem>>, vector<2x4xf32>
    tpu.vector_store %arg5[%c0_12, %c0_13], %24 {strides = array<i32>} : memref<2x4xf32, #tpu.memory_space<vmem>>, vector<2x4xf32>,
    %26 = vector.broadcast %13 : vector<2x1xf32> to vector<2x8xf32>
    %27 = arith.mulf %10, %26 : vector<2x8xf32>
    %c0_14 = arith.constant 0 : index
    %c0_15 = arith.constant 0 : index
    %28 = vector.load %arg6[%c0_14, %c0_15] : memref<2x8xf32, #tpu.memory_space<vmem>>, vector<2x8xf32>
    tpu.vector_store %arg6[%c0_14, %c0_15], %27 {strides = array<i32>} : memref<2x8xf32, #tpu.memory_space<vmem>>, vector<2x8xf32>,
    return
  }
  func.func @transform_0(%arg0: i32) -> (i32, i32, i32) {
    %c0_i32 = arith.constant 0 : i32
    %c0_i32_0 = arith.constant 0 : i32
    %c0_i32_1 = arith.constant 0 : i32
    return %arg0, %c0_i32, %c0_i32_0 : i32, i32, i32
  }
  func.func @transform_1(%arg0: i32) -> (i32, i32) {
    %c0_i32 = arith.constant 0 : i32
    %c0_i32_0 = arith.constant 0 : i32
    %c0_i32_1 = arith.constant 0 : i32
    return %c0_i32, %c0_i32_0 : i32, i32
  }
  func.func @transform_2(%arg0: i32) -> (i32, i32) {
    %c0_i32 = arith.constant 0 : i32
    %c0_i32_0 = arith.constant 0 : i32
    %c0_i32_1 = arith.constant 0 : i32
    return %c0_i32, %c0_i32_0 : i32, i32
  }
  func.func @transform_3(%arg0: i32) -> (i32, i32) {
    %c0_i32 = arith.constant 0 : i32
    %c0_i32_0 = arith.constant 0 : i32
    %c0_i32_1 = arith.constant 0 : i32
    return %c0_i32, %c0_i32_0 : i32, i32
  }
  func.func @transform_4(%arg0: i32) -> (i32, i32) {
    %c0_i32 = arith.constant 0 : i32
    %c0_i32_0 = arith.constant 0 : i32
    return %arg0, %c0_i32 : i32, i32
  }
  func.func @transform_5(%arg0: i32) -> (i32, i32) {
    %c0_i32 = arith.constant 0 : i32
    %c0_i32_0 = arith.constant 0 : i32
    return %arg0, %c0_i32 : i32, i32
  }
}

</mosaic_0001>

<bundles_post_ra>
// kernel: tpu_custom_call.1
= control target key start
LH: loop header
LB: loop body
LE: loop exit
PB: predicated region body
PF: predicated region fallthrough
CT: control target
= control target key end

     0   :  { %11 = vsyncpa [#allocation3], 0  ;;  %vm32_vm0 = vcmask 261120   ;;  %s469_s0 = inlined_call_operand.vmem [shape: f32[2,8,32], index: 0, kind: input, shape index: {}]   ;;  %s470_s1 = inlined_call_operand.vmem [shape: f32[1,32], index: 1, kind: input, shape index: {}]   ;;  %s471_s2 = inlined_call_operand.vmem [shape: f32[32,4], index: 2, kind: input, shape index: {}]   ;;  %s472_s3 = inlined_call_operand.vmem [shape: f32[1,4], index: 3, kind: input, shape index: {}]   ;;  %s473_s4 = inlined_call_operand.hbm [shape: f32[2,4], index: 4, kind: output, shape index: {0}]   ;;  %s474_s5 = inlined_call_operand.hbm [shape: f32[2,8], index: 5, kind: output, shape index: {1}]  }
   0x1   :  { %v395_v0 = vld [vmem:[%s469_s0] sm:$0xff]  ;;  %v22_v2 = vld [vmem:[%s469_s0 + $0x8] sm:$0xff] }
   0x2   :  { %v269_v1 = vld [vmem:[%s470_s1] ss:$0 sm:$0xff] }
   0x3   :  { %v30_v3 = vmul.f32 %v269_v1, %v395_v0  ;;  %v31_v4 = vmul.f32 %v269_v1, %v22_v2 }
   0x4   :  { %12 = vsyncpa [#allocation5], 0  ;;  %v41_v7 = vlaneseq  ;;  %vm51_vm1 = vcmask 1041409   ;;  %vm54_vm2 = vcmask 58368   ;;  %v356_v17 = vmov 0   ;;  %v121_v35 = vld [vmem:[%s471_s2] sm:$0xff] }
   0x5   :  { %v33_v5 = vsel %vm32_vm0, %v30_v3, 0.0  ;;  %v36_v6 = vsel %vm32_vm0, %v31_v4, 0.0  ;;  %301 = vset.pattern.permute.xlu0 %v356_v17  ;;  %300 = vset.pattern.permute.xlu1 %v356_v17  ;;  %v122_v36 = vld [vmem:[%s471_s2 + $0x8] sm:$0xff]  ;;  %v123_v37 = vld [vmem:[%s471_s2 + $0x10] sm:$0xff]  ;;  %v357_v38 = vmov 0.0|0.0   ;;  %v124_v40 = vld [vmem:[%s471_s2 + $0x18] sm:$0xff] }
   0x6   :  { %34 = vadd.xlane.f32.xlu0 %v33_v5  ;;  %v42_v8 = vand.u32 127, %v41_v7  ;;  %v406_v9 = vshrl.u32 %v41_v7, 7  ;;  %288 = vmatprep.subr.bf16.mxu0 %v357_v38  ;;  %v289_v39 = vpack.c.bf16 %v122_v36, %v121_v35  ;;  %v292_v41 = vpack.c.bf16 %v124_v40, %v123_v37  ;;  %s360_s2 = smov [#allocation4]  }
   0x7   :  { %vm358_vm3 = vmmov 0   ;;  %v359_v42 = vmov 0.0   ;;  %s257_s30 = sshll.u32 %s360_s2, 4  ;;  %s258_s30 = int_to_ptr.vmem [resolvable:$true] %s257_s30 }
   0x8   :  { %v409_v11 = vsub.s32 %v42_v8, %v406_v9  ;;  %v61_v18 = vsub.s32 0, %v406_v9  ;;  %v65_v19 = vsub.s32 1, %v406_v9  ;;  %290 = vmatpush3.bf16.msra.mxu0 %v289_v39  ;;  %285 = vmatprep.mubr.msk.f32.mxu0 %vm358_vm3, %v359_v42  ;;  %s308_s6 = scalar_lea.vmem %s258_s30, 32  ;;  %p313_p1 = scmp.lt.s32.totalorder %s258_s30, %s258_s30 }
   0x9   :  { %291 = vmatprep.subr.bf16.mxu0 %v357_v38  ;;  %p309_p0 = scmp.ne.s32.totalorder %s258_s30, %s308_s6  ;;  %p314_p2 = scmp.lt.s32.totalorder %s308_s6, %s308_s6 }
   0xa   :  { %37 = vadd.xlane.f32.xlu0 %v36_v6 }
   0xb   :  { %p315_p3 = por %p314_p2, %p313_p1 }
   0xc   :  { %293 = vmatpush3.bf16.msra.mxu0 %v292_v41 }
   0xd   :  { %p316_p4 = pnand %p315_p3, %p309_p0 }
  0x93   :  { %v35_v10 = vpop.xlane.xlu0 %34 }
  0x94   :  { %v46_v13 = vrot.slane %v35_v10, %v409_v11 }
  0x97   :  { %v38_v12 = vpop.xlane.xlu0 %37 }
  0x98   :  { %v50_v14 = vrot.slane %v38_v12, %v409_v11 }
  0x9a   :  { %v52_v15 = vsel %vm51_vm1, %v50_v14, %v46_v13 }
  0x9b   :  { %v55_v16 = vsel %vm54_vm2, %v52_v15, -inf }
  0x9c   :  { %56 = vmax.xlane.f32.xlu1 %v55_v16 }
 0x129   :  { %v57_v20 = vpop.xlane.xlu1 %56 }
 0x12a   :  { %v62_v21 = vrot.slane %v57_v20, %v61_v18  ;;  %v66_v22 = vrot.slane %v57_v20, %v65_v19 }
 0x12c   :  { %v69_v23 = vsub.f32 %v35_v10, %v62_v21  ;;  %v70_v24 = vsub.f32 %v38_v12, %v66_v22 }
 0x12e   :  { %v71_v25 = vmul.f32 1.442695, %v69_v23  ;;  %v73_v26 = vmul.f32 1.442695, %v70_v24 }
 0x130   :  { %302 = vpow2.f32 %v71_v25 }
 0x131   :  { %304 = vpow2.f32 %v73_v26 }
 0x13a   :  { %v303_v27 = vpop.eup %302 }
 0x13b   :  { %v305_v28 = vpop.eup %304  ;;  %78 = vperm.xlu1 %300, %v303_v27  }
 0x13c   :  { %81 = vperm.xlu0 %301, %v305_v28  }
 0x1ba   :  { %v79_v29 = vpop.permute.xlu1 %78 }
 0x1bb   :  { %v82_v30 = vpop.permute.xlu0 %81  ;;  %v86_v31 = vrot.slane %v79_v29, %v409_v11  ;;  %v99_v44 = vmul.f32 %v79_v29, %v395_v0 }
 0x1bc   :  { %v90_v32 = vrot.slane %v82_v30, %v409_v11  ;;  %v100_v43 = vmul.f32 %v82_v30, %v22_v2 }
 0x1bd   :  { %v101_v46 = vsel %vm32_vm0, %v99_v44, 0.0 }
 0x1be   :  { %v91_v33 = vsel %vm51_vm1, %v90_v32, %v86_v31  ;;  %v108_v45 = vsel %vm32_vm0, %v100_v43, 0.0  ;;  %v102_v48 = vrot.slane %v101_v46, 4 }
 0x1bf   :  { %v93_v34 = vsel %vm54_vm2, %v91_v33, 0.0  ;;  %v109_v47 = vrot.slane %v108_v45, 4 }
 0x1c0   :  { %94 = vadd.xlane.f32.xlu1 %v93_v34  ;;  %v103_v50 = vadd.f32 %v102_v48, %v101_v46 }
 0x1c1   :  { %v110_v49 = vadd.f32 %v109_v47, %v108_v45 }
 0x1c2   :  { %v104_v53 = vrot.slane %v103_v50, 2 }
 0x1c3   :  { %v111_v51 = vrot.slane %v110_v49, 2 }
 0x1c4   :  { %v105_v55 = vadd.f32 %v104_v53, %v103_v50 }
 0x1c5   :  { %v112_v54 = vadd.f32 %v111_v51, %v110_v49 }
 0x1c6   :  { %v106_v57 = vrot.slane %v105_v55, 1 }
 0x1c7   :  { %v113_v56 = vrot.slane %v112_v54, 1 }
 0x1c8   :  { %v107_v62 = vadd.f32 %v106_v57, %v105_v55 }
 0x1c9   :  { %v114_v59 = vadd.f32 %v113_v56, %v112_v54 }
 0x24d   :  { %v95_v52 = vpop.xlane.xlu1 %94 }
 0x24e   :  { %306 = vrcp.f32 %v95_v52 }
 0x258   :  { %v307_v58 = vpop.eup %306 }
 0x259   :  { %v213_v60 = vrot.slane %v307_v58, %v61_v18  ;;  %v116_v61 = vrot.slane %v307_v58, 1  ;;  %v217_v1 = vrot.slane %v307_v58, %v65_v19  ;;  %v119_v2 = vmul.f32 %v307_v58, %v107_v62 }
 0x25b   :  { %v220_v63 = vmul.f32 %v303_v27, %v213_v60  ;;  %v120_v0 = vmul.f32 %v116_v61, %v114_v59  ;;  %v221_v5 = vmul.f32 %v305_v28, %v217_v1 }
 0x25d   :  { %225 = vperm.xlu0 %301, %v220_v63   ;;  %v134_v3 = vrot.slane %v120_v0, 7 }
 0x25f   :  { %v135_v4 = vsel %vm51_vm1, %v134_v3, %v119_v2 }
 0x260   :  { %286 = vmatmul.mubr.msk.f32.vlgmr.msra.gmra.mrb[0].mxu0 %vm32_vm0, %v135_v4 }
 0x261   :  { %228 = vperm.xlu0 %301, %v221_v5  }
 0x2dc   :  { %v226_v6 = vpop.permute.xlu0 %225 }
 0x2dd   :  { %v233_v8 = vrot.slane %v226_v6, %v409_v11 }
 0x2e0   :  { %v229_v7 = vpop.permute.xlu0 %228 }
 0x2e1   :  { %v237_v9 = vrot.slane %v229_v7, %v409_v11 }
 0x2e3   :  { %v238_v10 = vsel %vm51_vm1, %v237_v9, %v233_v8 }
 0x2e4   :  { %240 = vst.msk [vmem:[#allocation4] sm:$0x3] %vm54_vm2, %v238_v10 }
 0x2e5   :  { %319 = shalt.err (!%p316_p4)
}
 0x2e6   :  { %s320_s9 = scalar_lea.hbm %s474_s5, 32 }
 0x2e7   :  { %p321_p5 = scmp.ne.s32.totalorder %s474_s5, %s320_s9  ;;  %p324_p6 = scmp.lt.u32.totalorder %s320_s9, %s474_s5 }
 0x2e9   :  { %p326_p7 = pnand %p324_p6, %p321_p5 }
 0x2eb   :  { %329 = shalt.err (!%p326_p7)
}
 0x2ec   :  { %260 = dma.vmem_to_hbm [thread:$0]  %s258_s30, 32, %s474_s5, [#allocation5]   ;;  %v270_v11 = vld [vmem:[%s472_s3] ss:$0 sm:$0xff]  ;;  %vm208_vm4 = vcmask 25600  }
 0x2ed   :  { %s361_s18 = smov [#allocation2]  }
 0x2ee   :  { %s247_s19 = sshll.u32 %s361_s18, 4  ;;  %s248_s19 = int_to_ptr.vmem [resolvable:$true] %s247_s19 }
 0x2ef   :  { %s330_s20 = scalar_lea.vmem %s248_s19, 32  ;;  %p335_p9 = scmp.lt.s32.totalorder %s248_s19, %s248_s19 }
 0x2f0   :  { %p331_p8 = scmp.ne.s32.totalorder %s248_s19, %s330_s20  ;;  %p336_p10 = scmp.lt.s32.totalorder %s330_s20, %s330_s20 }
 0x2f2   :  { %p337_p11 = por %p336_p10, %p335_p9 }
 0x2f4   :  { %p338_p12 = pnand %p337_p11, %p331_p8 }
 0x333   :  { %v204_v12 = vpop.f32.mrb[0].mxu0 }
 0x334   :  { %v205_v13 = vadd.f32 %v270_v11, %v204_v12  ;;  %v287_v14 = vpop.f32.mrb[1].mxu0 }
 0x336   :  { %209 = vst.msk [vmem:[#allocation2] sm:$0x3] %vm208_vm4, %v205_v13 }
 0x337   :  { %341 = shalt.err (!%p338_p12)
}
 0x338   :  { %s342_s22 = scalar_lea.hbm %s473_s4, 32 }
 0x339   :  { %p343_p13 = scmp.ne.s32.totalorder %s473_s4, %s342_s22  ;;  %p346_p0 = scmp.lt.u32.totalorder %s342_s22, %s473_s4 }
 0x33b   :  { %p348_p1 = pnand %p346_p0, %p343_p13 }
 0x33d   :  { %351 = shalt.err (!%p348_p1)
}
 0x33e   :  { %250 = dma.vmem_to_hbm [thread:$0]  %s248_s19, 32, %s473_s4, [#allocation3]  }
 0x33f   :  { %352 = dma.done.wait [#allocation3], 32  }
 0x340   :  { %353 = vsyncadd [#allocation3], 4294967264 }
 0x341   :  { %354 = dma.done.wait [#allocation5], 32  }
 0x342   :  { %355 = vsyncadd [#allocation5], 4294967264 }
 0x343   :  { %267 = vsyncpa [#allocation3], 1 }
 0x344   :  { %268 = vsyncpa [#allocation5], 1 }

</bundles_post_ra>
